<compile_context>
chip_gen: v5e
topology: v5e:2x2
jax: 0.10.0
libtpu: 0.0.40
codegen_flags: <defaults>
</compile_context>

<pallas_src>
import functools

import jax
import jax.numpy as jnp
from jax.experimental import pallas as pl
from jax.experimental.pallas import tpu as pltpu

# Logical (PyTorch) dims and lane/sublane-aligned padded dims.
IN_F, H1, H2, OUT_F = 6, 500, 100, 2
IN_P, H1_P, H2_P, OUT_P = 8, 512, 128, 128


def _round_up(n, m):
    return (n + m - 1) // m * m


def fnn_kernel(x_ref, w1_ref, b1_ref, w2_ref, b2_ref, w3_ref, b3_ref, o_ref,
               *, use_bf16_matmul, approx_sigmoid):
    # Entire 3-layer chain fused; intermediates live in VMEM/vregs only.
    x = x_ref[...]

    def mm(a, w_ref):
        w = w_ref[...]
        if use_bf16_matmul:
            # bf16 operands for the MXU (native on v6e/v7x), f32 accumulation.
            a = a.astype(jnp.bfloat16)
            w = w.astype(jnp.bfloat16)
        return jnp.dot(a, w, preferred_element_type=jnp.float32)

    # f32 epilogue (bias + ReLU) on the f32 accumulators (keeps v5e VPU happy too).
    h1 = jnp.maximum(mm(x, w1_ref) + b1_ref[...], 0.0)        # (TB, 512) f32
    h2 = jnp.maximum(mm(h1, w2_ref) + b2_ref[...], 0.0)       # (TB, 128) f32
    logits = mm(h2, w3_ref) + b3_ref[...]                      # (TB, 128) f32

    # sigmoid(z) = 1 / (1 + exp(-z)); exp (+ approx reciprocal) issue on the EUP slot.
    denom = 1.0 + jnp.exp(-logits)
    if approx_sigmoid:
        out = pl.reciprocal(denom, approx=True)
    else:
        out = 1.0 / denom
    o_ref[...] = out.astype(o_ref.dtype)


def fnn_forward(x, params, *, use_bf16_matmul=True, approx_sigmoid=None,
                max_batch_tile=512):
    """x: (B, 6) f32. params: raw (unpadded) weights in (in, out) layout + 1-D biases."""
    if approx_sigmoid is None:
        approx_sigmoid = use_bf16_matmul
    w1, b1, w2, b2, w3, b3 = params
    B = x.shape[0]
    f32 = jnp.float32

    # --- Zero-pad all feature dims to (8, 128)-aligned sizes (exact through ReLU). ---
    w1p = jnp.zeros((IN_P, H1_P), f32).at[:IN_F, :H1].set(w1.astype(f32))
    b1p = jnp.zeros((1, H1_P), f32).at[0, :H1].set(b1.astype(f32))
    w2p = jnp.zeros((H1_P, H2_P), f32).at[:H1, :H2].set(w2.astype(f32))
    b2p = jnp.zeros((1, H2_P), f32).at[0, :H2].set(b2.astype(f32))
    w3p = jnp.zeros((H2_P, OUT_P), f32).at[:H2, :OUT_F].set(w3.astype(f32))
    b3p = jnp.zeros((1, OUT_P), f32).at[0, :OUT_F].set(b3.astype(f32))

    # --- Batch tiling: amortize per-step overhead, keep weights VMEM-resident. ---
    TB = min(max_batch_tile, _round_up(B, 8))      # sublane-aligned, VMEM-safe on v7x
    B_pad = _round_up(B, TB)
    x_pad = jnp.zeros((B_pad, IN_P), f32).at[:B, :IN_F].set(x.astype(f32))

    kernel = functools.partial(fnn_kernel,
                               use_bf16_matmul=use_bf16_matmul,
                               approx_sigmoid=approx_sigmoid)

    def wspec(shape):
        # Constant index_map: weight/bias blocks revisit the same tile -> no re-DMA per step.
        return pl.BlockSpec(shape, lambda i: (0, 0))

    out_pad = pl.pallas_call(
        kernel,
        out_shape=jax.ShapeDtypeStruct((B_pad, OUT_P), jnp.float32),
        grid=(B_pad // TB,),
        in_specs=[
            pl.BlockSpec((TB, IN_P), lambda i: (i, 0)),    # x batch tile
            wspec((IN_P, H1_P)),  wspec((1, H1_P)),        # W1, b1 (resident)
            wspec((H1_P, H2_P)),  wspec((1, H2_P)),        # W2, b2 (resident)
            wspec((H2_P, OUT_P)), wspec((1, OUT_P)),       # W3, b3 (resident)
        ],
        out_specs=pl.BlockSpec((TB, OUT_P), lambda i: (i, 0)),
        compiler_params=pltpu.CompilerParams(
            dimension_semantics=("parallel",),             # shard batch tiles across TCs
        ),
    )(x_pad, w1p, b1p, w2p, b2p, w3p, b3p)

    # Drop batch padding and padded output lanes (they hold sigmoid(0)=0.5).
    return out_pad[:B, :OUT_F]


def init_params(key):
    """Deterministic init mimicking nn.Linear's U(-1/sqrt(fan_in), 1/sqrt(fan_in)).
    Weights stored as (in, out) (transposed vs PyTorch) so the kernel does x @ W."""
    def linear(key, fan_in, fan_out):
        kw, kb = jax.random.split(key)
        bound = 1.0 / float(fan_in) ** 0.5
        w = jax.random.uniform(kw, (fan_in, fan_out), jnp.float32, -bound, bound)
        b = jax.random.uniform(kb, (fan_out,), jnp.float32, -bound, bound)
        return w, b

    k1, k2, k3 = jax.random.split(key, 3)
    w1, b1 = linear(k1, IN_F, H1)
    w2, b2 = linear(k2, H1, H2)
    w3, b3 = linear(k3, H2, OUT_F)
    return (w1, b1, w2, b2, w3, b3)


def fnn_reference(x, params):
    w1, b1, w2, b2, w3, b3 = params
    h1 = jnp.maximum(x @ w1 + b1, 0.0)
    h2 = jnp.maximum(h1 @ w2 + b2, 0.0)
    return jax.nn.sigmoid(h2 @ w3 + b3)


if __name__ == "__main__":
    key = jax.random.PRNGKey(0)
    k_params, k_x = jax.random.split(key)

    params = init_params(k_params)
    x = jax.random.normal(k_x, (16, IN_F), jnp.float32)   # batch=16, in_features=6

    ref = fnn_reference(x, params)

    # Exact path: f32 MXU matmuls + exact sigmoid -> tight check vs the reference.
    out_f32 = jax.block_until_ready(
        fnn_forward(x, params, use_bf16_matmul=False, approx_sigmoid=False))
    assert out_f32.shape == (16, OUT_F)
    assert jnp.allclose(out_f32, ref, atol=1e-5, rtol=1e-5)

    # Fast path (default): bf16 matmul operands + approx reciprocal; multi-tile grid
    # (max_batch_tile=8 -> grid of 2 "parallel" batch tiles) to exercise the pipeline.
    fwd = jax.jit(functools.partial(fnn_forward, use_bf16_matmul=True, max_batch_tile=8))
    out_bf16 = jax.block_until_ready(fwd(x, params))
    assert out_bf16.shape == (16, OUT_F)
    assert jnp.allclose(out_bf16, ref, atol=5e-2, rtol=5e-2)

    print("KERNEL_OK")
</pallas_src>

<mosaic_0001>
module attributes {stable_mosaic.version = 11 : i64} {
  func.func @fnn_kernel(%arg0: i32, %arg1: memref<16x8xf32, #tpu.memory_space<vmem>>, %arg2: memref<8x512xf32, #tpu.memory_space<vmem>>, %arg3: memref<1x512xf32, #tpu.memory_space<vmem>>, %arg4: memref<512x128xf32, #tpu.memory_space<vmem>>, %arg5: memref<1x128xf32, #tpu.memory_space<vmem>>, %arg6: memref<128x128xf32, #tpu.memory_space<vmem>>, %arg7: memref<1x128xf32, #tpu.memory_space<vmem>>, %arg8: memref<16x128xf32, #tpu.memory_space<vmem>>) attributes {dimension_semantics = [#tpu.dimension_semantics<parallel>], iteration_bounds = array<i64: 1>, scalar_prefetch = 0 : i64, scratch_operands = 0 : i64, tpu.core_type = #tpu.core_type<tc>, window_params = [{transform_indices = @transform_0, window_bounds = array<i64: 16, 8>}, {pipeline_mode = #tpu.pipeline_mode<synchronous>, transform_indices = @transform_1, window_bounds = array<i64: 8, 512>}, {pipeline_mode = #tpu.pipeline_mode<synchronous>, transform_indices = @transform_2, window_bounds = array<i64: 1, 512>}, {pipeline_mode = #tpu.pipeline_mode<synchronous>, transform_indices = @transform_3, window_bounds = array<i64: 512, 128>}, {pipeline_mode = #tpu.pipeline_mode<synchronous>, transform_indices = @transform_4, window_bounds = array<i64: 1, 128>}, {pipeline_mode = #tpu.pipeline_mode<synchronous>, transform_indices = @transform_5, window_bounds = array<i64: 128, 128>}, {pipeline_mode = #tpu.pipeline_mode<synchronous>, transform_indices = @transform_6, window_bounds = array<i64: 1, 128>}, {transform_indices = @transform_7, window_bounds = array<i64: 16, 128>}]} {
    %c0 = arith.constant 0 : index
    %c0_0 = arith.constant 0 : index
    %0 = vector.load %arg1[%c0, %c0_0] : memref<16x8xf32, #tpu.memory_space<vmem>>, vector<16x8xf32>
    %c0_1 = arith.constant 0 : index
    %c0_2 = arith.constant 0 : index
    %1 = vector.load %arg2[%c0_1, %c0_2] : memref<8x512xf32, #tpu.memory_space<vmem>>, vector<8x512xf32>
    %cst = arith.constant dense<0.000000e+00> : vector<16x512xf32>
    %2 = tpu.matmul %0, %1, %cst {dimension_numbers = #tpu.dot_dimension_numbers<[1], [0], [0], [1], [0, 0, 1, 1], [], []>} : vector<16x8xf32>, vector<8x512xf32>, vector<16x512xf32> -> vector<16x512xf32>
    %c0_3 = arith.constant 0 : index
    %c0_4 = arith.constant 0 : index
    %3 = vector.load %arg3[%c0_3, %c0_4] : memref<1x512xf32, #tpu.memory_space<vmem>>, vector<1x512xf32>
    %4 = vector.broadcast %3 : vector<1x512xf32> to vector<16x512xf32>
    %5 = arith.addf %2, %4 : vector<16x512xf32>
    %cst_5 = arith.constant 0.000000e+00 : f32
    %6 = vector.broadcast %cst_5 : f32 to vector<16x512xf32>
    %7 = arith.maximumf %5, %6 : vector<16x512xf32>
    %c0_6 = arith.constant 0 : index
    %c0_7 = arith.constant 0 : index
    %8 = vector.load %arg4[%c0_6, %c0_7] : memref<512x128xf32, #tpu.memory_space<vmem>>, vector<512x128xf32>
    %cst_8 = arith.constant dense<0.000000e+00> : vector<16x128xf32>
    %9 = tpu.matmul %7, %8, %cst_8 {dimension_numbers = #tpu.dot_dimension_numbers<[1], [0], [0], [1], [0, 0, 1, 1], [], []>} : vector<16x512xf32>, vector<512x128xf32>, vector<16x128xf32> -> vector<16x128xf32>
    %c0_9 = arith.constant 0 : index
    %c0_10 = arith.constant 0 : index
    %10 = vector.load %arg5[%c0_9, %c0_10] : memref<1x128xf32, #tpu.memory_space<vmem>>, vector<1x128xf32>
    %11 = vector.broadcast %10 : vector<1x128xf32> to vector<16x128xf32>
    %12 = arith.addf %9, %11 : vector<16x128xf32>
    %cst_11 = arith.constant 0.000000e+00 : f32
    %13 = vector.broadcast %cst_11 : f32 to vector<16x128xf32>
    %14 = arith.maximumf %12, %13 : vector<16x128xf32>
    %c0_12 = arith.constant 0 : index
    %c0_13 = arith.constant 0 : index
    %15 = vector.load %arg6[%c0_12, %c0_13] : memref<128x128xf32, #tpu.memory_space<vmem>>, vector<128x128xf32>
    %cst_14 = arith.constant dense<0.000000e+00> : vector<16x128xf32>
    %16 = tpu.matmul %14, %15, %cst_14 {dimension_numbers = #tpu.dot_dimension_numbers<[1], [0], [0], [1], [0, 0, 1, 1], [], []>} : vector<16x128xf32>, vector<128x128xf32>, vector<16x128xf32> -> vector<16x128xf32>
    %c0_15 = arith.constant 0 : index
    %c0_16 = arith.constant 0 : index
    %17 = vector.load %arg7[%c0_15, %c0_16] : memref<1x128xf32, #tpu.memory_space<vmem>>, vector<1x128xf32>
    %18 = vector.broadcast %17 : vector<1x128xf32> to vector<16x128xf32>
    %19 = arith.addf %16, %18 : vector<16x128xf32>
    %cst_17 = arith.constant 0.000000e+00 : f32
    %20 = vector.broadcast %cst_17 : f32 to vector<16x128xf32>
    %21 = arith.subf %20, %19 : vector<16x128xf32>
    %22 = math.exp %21 : vector<16x128xf32>
    %cst_18 = arith.constant 1.000000e+00 : f32
    %23 = vector.broadcast %cst_18 : f32 to vector<16x128xf32>
    %24 = arith.addf %23, %22 : vector<16x128xf32>
    %cst_19 = arith.constant 1.000000e+00 : f32
    %25 = vector.broadcast %cst_19 : f32 to vector<16x128xf32>
    %26 = arith.divf %25, %24 : vector<16x128xf32>
    %c0_20 = arith.constant 0 : index
    %c0_21 = arith.constant 0 : index
    %27 = vector.load %arg8[%c0_20, %c0_21] : memref<16x128xf32, #tpu.memory_space<vmem>>, vector<16x128xf32>
    tpu.vector_store %arg8[%c0_20, %c0_21], %26 {strides = array<i32>} : memref<16x128xf32, #tpu.memory_space<vmem>>, vector<16x128xf32>,
    return
  }
  func.func @transform_0(%arg0: i32) -> (i32, i32) {
    %c0_i32 = arith.constant 0 : i32
    %c0_i32_0 = arith.constant 0 : i32
    return %arg0, %c0_i32 : i32, i32
  }
  func.func @transform_1(%arg0: i32) -> (i32, i32) {
    %c0_i32 = arith.constant 0 : i32
    %c0_i32_0 = arith.constant 0 : i32
    %c0_i32_1 = arith.constant 0 : i32
    return %c0_i32, %c0_i32_0 : i32, i32
  }
  func.func @transform_2(%arg0: i32) -> (i32, i32) {
    %c0_i32 = arith.constant 0 : i32
    %c0_i32_0 = arith.constant 0 : i32
    %c0_i32_1 = arith.constant 0 : i32
    return %c0_i32, %c0_i32_0 : i32, i32
  }
  func.func @transform_3(%arg0: i32) -> (i32, i32) {
    %c0_i32 = arith.constant 0 : i32
    %c0_i32_0 = arith.constant 0 : i32
    %c0_i32_1 = arith.constant 0 : i32
    return %c0_i32, %c0_i32_0 : i32, i32
  }
  func.func @transform_4(%arg0: i32) -> (i32, i32) {
    %c0_i32 = arith.constant 0 : i32
    %c0_i32_0 = arith.constant 0 : i32
    %c0_i32_1 = arith.constant 0 : i32
    return %c0_i32, %c0_i32_0 : i32, i32
  }
  func.func @transform_5(%arg0: i32) -> (i32, i32) {
    %c0_i32 = arith.constant 0 : i32
    %c0_i32_0 = arith.constant 0 : i32
    %c0_i32_1 = arith.constant 0 : i32
    return %c0_i32, %c0_i32_0 : i32, i32
  }
  func.func @transform_6(%arg0: i32) -> (i32, i32) {
    %c0_i32 = arith.constant 0 : i32
    %c0_i32_0 = arith.constant 0 : i32
    %c0_i32_1 = arith.constant 0 : i32
    return %c0_i32, %c0_i32_0 : i32, i32
  }
  func.func @transform_7(%arg0: i32) -> (i32, i32) {
    %c0_i32 = arith.constant 0 : i32
    %c0_i32_0 = arith.constant 0 : i32
    return %arg0, %c0_i32 : i32, i32
  }
}

</mosaic_0001>

<bundles_post_ra>
// kernel: tpu_custom_call.1
= control target key start
LH: loop header
LB: loop body
LE: loop exit
PB: predicated region body
PF: predicated region fallthrough
CT: control target
= control target key end

     0   :  { %12 = vsyncpa [#allocation3], 0  ;;  %s704_s0 = inlined_call_operand.vmem [shape: f32[16,8], index: 0, kind: input, shape index: {}]   ;;  %s705_s1 = inlined_call_operand.hbm [shape: f32[8,512], index: 1, kind: input, shape index: {}]   ;;  %s706_s2 = inlined_call_operand.vmem [shape: f32[1,512], index: 2, kind: input, shape index: {}]   ;;  %s707_s3 = inlined_call_operand.hbm [shape: f32[512,128], index: 3, kind: input, shape index: {}]   ;;  %s708_s4 = inlined_call_operand.vmem [shape: f32[1,128], index: 4, kind: input, shape index: {}]   ;;  %s709_s5 = inlined_call_operand.hbm [shape: f32[128,128], index: 5, kind: input, shape index: {}]   ;;  %s710_s6 = inlined_call_operand.vmem [shape: f32[1,128], index: 6, kind: input, shape index: {}]   ;;  %s711_s7 = inlined_call_operand.hbm [shape: f32[16,128], index: 7, kind: output, shape index: {}]  }
   0x1   :  { %13 = vsyncpa [#allocation6], 0  ;;  %s34_s26 = sshll.u32 %s707_s3, 4  ;;  %s35_s26 = int_to_ptr.hbm [resolvable:$true] %s34_s26 }
   0x2   :  { %14 = vsyncpa [#allocation4], 0  ;;  %s602_s27 = smov [#allocation5]   ;;  %s22_s8 = sshll.u32 %s705_s1, 4  ;;  %s23_s8 = int_to_ptr.hbm [resolvable:$true] %s22_s8 }
   0x3   :  { %s36_s28 = sshll.u32 %s602_s27, 4  ;;  %s603_s9 = smov 128   ;;  %s37_s28 = int_to_ptr.vmem [resolvable:$true] %s36_s28 }
   0x4   :  { %s604_s10 = smov 8   ;;  %s605_s11 = smov [#allocation2]  }
   0x5   :  { %42 = dma.hbm_to_vmem [thread:$0]  %s35_s26, 8192, %s37_s28, [#allocation6], %s603_s9, %s603_s9, %s604_s10  }
   0x6   :  { %s24_s12 = sshll.u32 %s605_s11, 4  ;;  %s49_s14 = sshll.u32 %s709_s5, 4  ;;  %s25_s12 = int_to_ptr.vmem [resolvable:$true] %s24_s12  ;;  %s50_s14 = int_to_ptr.hbm [resolvable:$true] %s49_s14 }
   0x7   :  { %27 = dma.hbm_to_vmem [thread:$0]  %s23_s8, 512, %s25_s12, [#allocation3]  }
   0x8   :  { %s606_s15 = smov [#allocation7]  }
   0x9   :  { %s51_s16 = sshll.u32 %s606_s15, 4  ;;  %s52_s16 = int_to_ptr.vmem [resolvable:$true] %s51_s16 }
   0xa   :  { %57 = dma.hbm_to_vmem [thread:$0]  %s50_s14, 2048, %s52_s16, [#allocation6], %s603_s9, %s603_s9, %s604_s10  }
   0xb   :  { %596 = dma.done.wait [#allocation3], 512  }
   0xc   :  { %597 = vsyncadd [#allocation3], 4294966784 }
   0xd   :  { %598 = dma.done.wait [#allocation6], 10240  }
   0xe   :  { %599 = vsyncadd [#allocation6], 4294957056  ;;  %vm88_vm0 = vcmask 64512   ;;  %v74_v0 = vld [vmem:[#allocation2] sm:$0xff]  ;;  %v76_v2 = vld [vmem:[#allocation2 + $0x10] sm:$0xff]  ;;  %s446_s25 = sshll.u32 %s711_s7, 4  ;;  %s447_s25 = int_to_ptr.hbm [resolvable:$true] %s446_s25 }
   0xf   :  { %v666_v1 = vld [vmem:[%s704_s0] sm:$0xff]  ;;  %110 = vmatpush.msra.mxu2 %v74_v0  ;;  %v75_v3 = vld [vmem:[#allocation2 + $0x8] sm:$0xff]  ;;  %v77_v4 = vld [vmem:[#allocation2 + $0x18] sm:$0xff] }
  0x10   :  { %460 = vmatmul.msk.f32.vlgmr.msra.gmra.mxu2 %vm88_vm0, %v666_v1  ;;  %133 = vmatpush.msra.mxu3 %v75_v3  ;;  %v210_v5 = vld [vmem:[#allocation5 + $0x78] sm:$0xff]  ;;  %v209_v7 = vld [vmem:[#allocation5 + $0x70] sm:$0xff]  ;;  %v208_v9 = vld [vmem:[#allocation5 + $0x68] sm:$0xff] }
  0x11   :  { %v226_v6 = vld [vmem:[#allocation5 + $0xf8] sm:$0xff]  ;;  %156 = vmatpush.msrb.mxu2 %v76_v2  ;;  %462 = vmatmul.msk.f32.vlgmr.msra.gmra.mxu3 %vm88_vm0, %v666_v1  ;;  %v225_v8 = vld [vmem:[#allocation5 + $0xf0] sm:$0xff]  ;;  %v224_v10 = vld [vmem:[#allocation5 + $0xe8] sm:$0xff] }
  0x12   :  { %179 = vmatpush.msrb.mxu3 %v77_v4  ;;  %263 = vmatpush.msra.mxu0 %v210_v5  ;;  %v675_v11 = vld [vmem:[%s704_s0 + $0x8] sm:$0xff]  ;;  %v207_v12 = vld [vmem:[#allocation5 + $0x60] sm:$0xff]  ;;  %v242_v13 = vld [vmem:[#allocation5 + $0x178] sm:$0xff] }
  0x13   :  { %286 = vmatpush.msra.mxu1 %v226_v6  ;;  %v223_v14 = vld [vmem:[#allocation5 + $0xe0] sm:$0xff]  ;;  %309 = vmatpush.msra.mxu2 %v242_v13  ;;  %v206_v15 = vld [vmem:[#allocation5 + $0x58] sm:$0xff]  ;;  %v241_v16 = vld [vmem:[#allocation5 + $0x170] sm:$0xff] }
  0x14   :  { %264 = vmatpush.msra.mxu0 %v209_v7  ;;  %v222_v17 = vld [vmem:[#allocation5 + $0xd8] sm:$0xff]  ;;  %v205_v19 = vld [vmem:[#allocation5 + $0x50] sm:$0xff]  ;;  %v240_v20 = vld [vmem:[#allocation5 + $0x168] sm:$0xff] }
  0x15   :  { %287 = vmatpush.msra.mxu1 %v225_v8  ;;  %v258_v18 = vld [vmem:[#allocation5 + $0x1f8] sm:$0xff]  ;;  %v221_v21 = vld [vmem:[#allocation5 + $0xd0] sm:$0xff]  ;;  %310 = vmatpush.msra.mxu2 %v241_v16  ;;  %v204_v23 = vld [vmem:[#allocation5 + $0x48] sm:$0xff] }
  0x16   :  { %265 = vmatpush.msra.mxu0 %v208_v9  ;;  %v257_v22 = vld [vmem:[#allocation5 + $0x1f0] sm:$0xff]  ;;  %332 = vmatpush.msra.mxu3 %v258_v18  ;;  %v239_v24 = vld [vmem:[#allocation5 + $0x160] sm:$0xff]  ;;  %v220_v25 = vld [vmem:[#allocation5 + $0xc8] sm:$0xff] }
  0x17   :  { %288 = vmatpush.msra.mxu1 %v224_v10  ;;  %311 = vmatpush.msra.mxu2 %v240_v20  ;;  %v256_v26 = vld [vmem:[#allocation5 + $0x1e8] sm:$0xff]  ;;  %v203_v27 = vld [vmem:[#allocation5 + $0x40] sm:$0xff]  ;;  %v202_v29 = vld [vmem:[#allocation5 + $0x38] sm:$0xff] }
  0x18   :  { %461 = vmatmul.msk.f32.gmra.mxu2 %vm88_vm0, %v675_v11  ;;  %266 = vmatpush.msra.mxu0 %v207_v12  ;;  %v219_v28 = vld [vmem:[#allocation5 + $0xc0] sm:$0xff]  ;;  %v238_v30 = vld [vmem:[#allocation5 + $0x158] sm:$0xff]  ;;  %v201_v33 = vld [vmem:[#allocation5 + $0x30] sm:$0xff] }
  0x19   :  { %463 = vmatmul.msk.f32.gmra.mxu3 %vm88_vm0, %v675_v11  ;;  %289 = vmatpush.msra.mxu1 %v223_v14  ;;  %v218_v31 = vld [vmem:[#allocation5 + $0xb8] sm:$0xff]  ;;  %v255_v32 = vld [vmem:[#allocation5 + $0x1e0] sm:$0xff]  ;;  %v217_v34 = vld [vmem:[#allocation5 + $0xb0] sm:$0xff] }
  0x1a   :  { %267 = vmatpush.msra.mxu0 %v206_v15  ;;  %333 = vmatpush.msra.mxu3 %v257_v22  ;;  %v200_v35 = vld [vmem:[#allocation5 + $0x28] sm:$0xff]  ;;  %v199_v37 = vld [vmem:[#allocation5 + $0x20] sm:$0xff]  ;;  %v198_v39 = vld [vmem:[#allocation5 + $0x18] sm:$0xff] }
  0x1b   :  { %290 = vmatpush.msra.mxu1 %v222_v17  ;;  %312 = vmatpush.msra.mxu2 %v239_v24  ;;  %v216_v36 = vld [vmem:[#allocation5 + $0xa8] sm:$0xff]  ;;  %v215_v38 = vld [vmem:[#allocation5 + $0xa0] sm:$0xff]  ;;  %v197_v40 = vld [vmem:[#allocation5 + $0x10] sm:$0xff] }
  0x1c   :  { %268 = vmatpush.msra.mxu0 %v205_v19  ;;  %334 = vmatpush.msra.mxu3 %v256_v26  ;;  %v214_v41 = vld [vmem:[#allocation5 + $0x98] sm:$0xff]  ;;  %v237_v42 = vld [vmem:[#allocation5 + $0x150] sm:$0xff]  ;;  %v196_v44 = vld [vmem:[#allocation5 + $0x8] sm:$0xff] }
  0x1d   :  { %291 = vmatpush.msra.mxu1 %v221_v21  ;;  %313 = vmatpush.msra.mxu2 %v238_v30  ;;  %v254_v43 = vld [vmem:[#allocation5 + $0x1d8] sm:$0xff]  ;;  %v213_v45 = vld [vmem:[#allocation5 + $0x90] sm:$0xff]  ;;  %v236_v46 = vld [vmem:[#allocation5 + $0x148] sm:$0xff] }
  0x1e   :  { %269 = vmatpush.msra.mxu0 %v204_v23  ;;  %335 = vmatpush.msra.mxu3 %v255_v32  ;;  %v253_v47 = vld [vmem:[#allocation5 + $0x1d0] sm:$0xff]  ;;  %v195_v48 = vld [vmem:[#allocation5] sm:$0xff]  ;;  %v212_v49 = vld [vmem:[#allocation5 + $0x88] sm:$0xff] }
  0x1f   :  { %292 = vmatpush.msra.mxu1 %v220_v25  ;;  %314 = vmatpush.msra.mxu2 %v237_v42  ;;  %v235_v50 = vld [vmem:[#allocation5 + $0x140] sm:$0xff]  ;;  %v252_v51 = vld [vmem:[#allocation5 + $0x1c8] sm:$0xff]  ;;  %v234_v53 = vld [vmem:[#allocation5 + $0x138] sm:$0xff] }
  0x20   :  { %464 = vmatmul.msk.f32.vlgmr.msrb.gmra.mxu2 %vm88_vm0, %v666_v1  ;;  %270 = vmatpush.msra.mxu0 %v203_v27  ;;  %v211_v52 = vld [vmem:[#allocation5 + $0x80] sm:$0xff]  ;;  %v233_v55 = vld [vmem:[#allocation5 + $0x130] sm:$0xff]  ;;  %v250_v56 = vld [vmem:[#allocation5 + $0x1b8] sm:$0xff] }
  0x21   :  { %466 = vmatmul.msk.f32.vlgmr.msrb.gmra.mxu3 %vm88_vm0, %v666_v1  ;;  %293 = vmatpush.msra.mxu1 %v219_v28  ;;  %v251_v54 = vld [vmem:[#allocation5 + $0x1c0] sm:$0xff]  ;;  %v232_v57 = vld [vmem:[#allocation5 + $0x128] sm:$0xff]  ;;  %v249_v58 = vld [vmem:[#allocation5 + $0x1b0] sm:$0xff] }
  0x22   :  { %271 = vmatpush.msra.mxu0 %v202_v29  ;;  %336 = vmatpush.msra.mxu3 %v254_v43  ;;  %v231_v59 = vld [vmem:[#allocation5 + $0x120] sm:$0xff]  ;;  %v248_v60 = vld [vmem:[#allocation5 + $0x1a8] sm:$0xff]  ;;  %v230_v61 = vld [vmem:[#allocation5 + $0x118] sm:$0xff] }
  0x23   :  { %294 = vmatpush.msra.mxu1 %v218_v31  ;;  %315 = vmatpush.msra.mxu2 %v236_v46  ;;  %v247_v62 = vld [vmem:[#allocation5 + $0x1a0] sm:$0xff]  ;;  %v229_v63 = vld [vmem:[#allocation5 + $0x110] sm:$0xff]  ;;  %v246_v0 = vld [vmem:[#allocation5 + $0x198] sm:$0xff] }
  0x24   :  { %272 = vmatpush.msra.mxu0 %v201_v33  ;;  %337 = vmatpush.msra.mxu3 %v253_v47  ;;  %v228_v1 = vld [vmem:[#allocation5 + $0x108] sm:$0xff]  ;;  %v245_v2 = vld [vmem:[#allocation5 + $0x190] sm:$0xff]  ;;  %v227_v3 = vld [vmem:[#allocation5 + $0x100] sm:$0xff] }
  0x25   :  { %295 = vmatpush.msra.mxu1 %v217_v34  ;;  %316 = vmatpush.msra.mxu2 %v235_v50  ;;  %v244_v4 = vld [vmem:[#allocation5 + $0x188] sm:$0xff]  ;;  %v243_v5 = vld [vmem:[#allocation5 + $0x180] sm:$0xff]  ;;  %v372_v9 = vld [vmem:[#allocation7 + $0x78] sm:$0xff] }
  0x26   :  { %273 = vmatpush.msra.mxu0 %v200_v35  ;;  %338 = vmatpush.msra.mxu3 %v252_v51  ;;  %v78_v6 = vld [vmem:[%s706_s2] sm:$0xf]  ;;  %v364_v43 = vld [vmem:[#allocation7 + $0x38] sm:$0xff] }
  0x27   :  { %296 = vmatpush.msra.mxu1 %v216_v36  ;;  %317 = vmatpush.msra.mxu2 %v234_v53  ;;  %v80_v7 = vperm.slane %v78_v6, 0  ;;  %v81_v8 = vperm.slane %v78_v6, 1  ;;  %v82_v22 = vperm.slane %v78_v6, 2  ;;  %v83_v23 = vperm.slane %v78_v6, 3  ;;  %v371_v36 = vld [vmem:[#allocation7 + $0x70] sm:$0xff]  ;;  %v365_v42 = vld [vmem:[#allocation7 + $0x40] sm:$0xff] }
  0x28   :  { %465 = vmatmul.msk.f32.gmra.mxu2 %vm88_vm0, %v675_v11  ;;  %274 = vmatpush.msra.mxu0 %v199_v37  ;;  %v370_v37 = vld [vmem:[#allocation7 + $0x68] sm:$0xff]  ;;  %v361_v46 = vld [vmem:[#allocation7 + $0x20] sm:$0xff]  ;;  %v360_v47 = vld [vmem:[#allocation7 + $0x18] sm:$0xff] }
  0x29   :  { %467 = vmatmul.msk.f32.gmra.mxu3 %vm88_vm0, %v675_v11  ;;  %297 = vmatpush.msra.mxu1 %v215_v38  ;;  %v369_v38 = vld [vmem:[#allocation7 + $0x60] sm:$0xff] }
  0x2a   :  { %275 = vmatpush.msra.mxu0 %v198_v39  ;;  %339 = vmatpush.msra.mxu3 %v251_v54  ;;  %v368_v39 = vld [vmem:[#allocation7 + $0x58] sm:$0xff]  ;;  %v357_v50 = vld [vmem:[#allocation7] sm:$0xff] }
  0x2b   :  { %298 = vmatpush.msra.mxu1 %v214_v41  ;;  %318 = vmatpush.msra.mxu2 %v233_v55  ;;  %v366_v41 = vld [vmem:[#allocation7 + $0x48] sm:$0xff]  ;;  %v491_v6 = vld [vmem:[%s710_s6] ss:$0 sm:$0xff]  ;;  %s607_s6 = smov [#allocation8]  }
  0x2c   :  { %276 = vmatpush.msra.mxu0 %v197_v40  ;;  %340 = vmatpush.msra.mxu3 %v250_v56  ;;  %v367_v40 = vld [vmem:[#allocation7 + $0x50] sm:$0xff]  ;;  %s444_s22 = sshll.u32 %s607_s6, 4  ;;  %s445_s22 = int_to_ptr.vmem [resolvable:$true] %s444_s22 }
  0x2d   :  { %299 = vmatpush.msra.mxu1 %v213_v45  ;;  %319 = vmatpush.msra.mxu2 %v232_v57  ;;  %v362_v45 = vld [vmem:[#allocation7 + $0x28] sm:$0xff] }
  0x2e   :  { %277 = vmatpush.msra.mxu0 %v196_v44  ;;  %341 = vmatpush.msra.mxu3 %v249_v58  ;;  %v363_v44 = vld [vmem:[#allocation7 + $0x30] sm:$0xff] }
  0x2f   :  { %300 = vmatpush.msra.mxu1 %v212_v49  ;;  %320 = vmatpush.msra.mxu2 %v231_v59  ;;  %v358_v49 = vld [vmem:[#allocation7 + $0x8] sm:$0xff] }
  0x30   :  { %278 = vmatpush.msra.mxu0 %v195_v48  ;;  %342 = vmatpush.msra.mxu3 %v248_v60  ;;  %v359_v48 = vld [vmem:[#allocation7 + $0x10] sm:$0xff] }
  0x31   :  { %301 = vmatpush.msra.mxu1 %v211_v52  ;;  %321 = vmatpush.msra.mxu2 %v230_v61  ;;  %v490_v52 = vld [vmem:[%s708_s4] ss:$0 sm:$0xff] }
  0x32   :  { %343 = vmatpush.msra.mxu3 %v247_v62  ;;  %377 = vmatpush.msrb.mxu0 %v372_v9 }
  0x33   :  { %322 = vmatpush.msra.mxu2 %v229_v63  ;;  %468 = vmatpush.msrb.mxu1 %v372_v9 }
  0x34   :  { %344 = vmatpush.msra.mxu3 %v246_v0  ;;  %378 = vmatpush.msrb.mxu0 %v371_v36 }
  0x35   :  { %323 = vmatpush.msra.mxu2 %v228_v1  ;;  %469 = vmatpush.msrb.mxu1 %v371_v36 }
  0x36   :  { %345 = vmatpush.msra.mxu3 %v245_v2  ;;  %379 = vmatpush.msrb.mxu0 %v370_v37 }
  0x37   :  { %324 = vmatpush.msra.mxu2 %v227_v3  ;;  %470 = vmatpush.msrb.mxu1 %v370_v37 }
  0x38   :  { %346 = vmatpush.msra.mxu3 %v244_v4  ;;  %380 = vmatpush.msrb.mxu0 %v369_v38 }
  0x39   :  { %471 = vmatpush.msrb.mxu1 %v369_v38 }
  0x3a   :  { %347 = vmatpush.msra.mxu3 %v243_v5  ;;  %381 = vmatpush.msrb.mxu0 %v368_v39 }
  0x3b   :  { %472 = vmatpush.msrb.mxu1 %v368_v39 }
  0x3c   :  { %382 = vmatpush.msrb.mxu0 %v367_v40 }
  0x3d   :  { %473 = vmatpush.msrb.mxu1 %v367_v40 }
  0x3e   :  { %383 = vmatpush.msrb.mxu0 %v366_v41 }
  0x3f   :  { %474 = vmatpush.msrb.mxu1 %v366_v41 }
  0x40   :  { %384 = vmatpush.msrb.mxu0 %v365_v42 }
  0x41   :  { %475 = vmatpush.msrb.mxu1 %v365_v42 }
  0x42   :  { %385 = vmatpush.msrb.mxu0 %v364_v43 }
  0x43   :  { %476 = vmatpush.msrb.mxu1 %v364_v43 }
  0x44   :  { %386 = vmatpush.msrb.mxu0 %v363_v44 }
  0x45   :  { %477 = vmatpush.msrb.mxu1 %v363_v44 }
  0x46   :  { %387 = vmatpush.msrb.mxu0 %v362_v45 }
  0x47   :  { %478 = vmatpush.msrb.mxu1 %v362_v45 }
  0x48   :  { %388 = vmatpush.msrb.mxu0 %v361_v46 }
  0x49   :  { %479 = vmatpush.msrb.mxu1 %v361_v46 }
  0x4a   :  { %389 = vmatpush.msrb.mxu0 %v360_v47 }
  0x4b   :  { %480 = vmatpush.msrb.mxu1 %v360_v47 }
  0x4c   :  { %390 = vmatpush.msrb.mxu0 %v359_v48 }
  0x4d   :  { %481 = vmatpush.msrb.mxu1 %v359_v48 }
  0x4e   :  { %391 = vmatpush.msrb.mxu0 %v358_v49 }
  0x4f   :  { %482 = vmatpush.msrb.mxu1 %v358_v49 }
  0x50   :  { %392 = vmatpush.msrb.mxu0 %v357_v50 }
  0x51   :  { %483 = vmatpush.msrb.mxu1 %v357_v50 }
  0x93   :  { %v112_v10 = vpop.f32.mrf.mxu2 }
  0x94   :  { %v113_v11 = vadd.f32 %v112_v10, %v80_v7  ;;  %v135_v12 = vpop.f32.mrf.mxu3 }
  0x95   :  { %v136_v13 = vadd.f32 %v135_v12, %v81_v8 }
  0x96   :  { %v187_v14 = vmax.f32 %v113_v11, 0.0 }
  0x97   :  { %v188_v15 = vmax.f32 %v136_v13, 0.0 }
  0x98   :  { %279 = vmatmul.f32.vlgmr.msra.gmra.mxu0 %v187_v14 }
  0x99   :  { %302 = vmatmul.f32.vlgmr.msra.gmra.mxu1 %v188_v15 }
  0x9b   :  { %v115_v16 = vpop.f32.mrf.mxu2 }
  0x9c   :  { %v116_v17 = vadd.f32 %v115_v16, %v80_v7  ;;  %v138_v18 = vpop.f32.mrf.mxu3 }
  0x9d   :  { %v139_v19 = vadd.f32 %v138_v18, %v81_v8 }
  0x9e   :  { %v191_v20 = vmax.f32 %v116_v17, 0.0 }
  0x9f   :  { %v192_v21 = vmax.f32 %v139_v19, 0.0 }
  0xa0   :  { %282 = vmatmul.f32.gmra.mxu0 %v191_v20 }
  0xa1   :  { %305 = vmatmul.f32.gmra.mxu1 %v192_v21 }
  0xa3   :  { %v158_v24 = vpop.f32.mrf.mxu2 }
  0xa4   :  { %v159_v25 = vadd.f32 %v158_v24, %v82_v22  ;;  %v181_v26 = vpop.f32.mrf.mxu3 }
  0xa5   :  { %v182_v27 = vadd.f32 %v181_v26, %v83_v23 }
  0xa6   :  { %v189_v28 = vmax.f32 %v159_v25, 0.0 }
  0xa7   :  { %v190_v29 = vmax.f32 %v182_v27, 0.0 }
  0xa8   :  { %325 = vmatmul.f32.vlgmr.msra.gmra.mxu2 %v189_v28 }
  0xa9   :  { %348 = vmatmul.f32.vlgmr.msra.gmra.mxu3 %v190_v29 }
  0xab   :  { %v161_v30 = vpop.f32.mrf.mxu2 }
  0xac   :  { %v162_v31 = vadd.f32 %v161_v30, %v82_v22  ;;  %v184_v32 = vpop.f32.mrf.mxu3 }
  0xad   :  { %v185_v33 = vadd.f32 %v184_v32, %v83_v23 }
  0xae   :  { %v193_v34 = vmax.f32 %v162_v31, 0.0 }
  0xaf   :  { %v194_v35 = vmax.f32 %v185_v33, 0.0 }
  0xb0   :  { %328 = vmatmul.f32.gmra.mxu2 %v193_v34 }
  0xb1   :  { %351 = vmatmul.f32.gmra.mxu3 %v194_v35 }
 0x115   :  { %v280_v51 = vpop.f32.mrf.mxu0 }
 0x116   :  { %v303_v53 = vpop.f32.mrf.mxu1  ;;  %v281_v54 = vadd.f32 %v490_v52, %v280_v51 }
 0x118   :  { %v304_v55 = vadd.f32 %v303_v53, %v281_v54 }
 0x11d   :  { %v283_v56 = vpop.f32.mrf.mxu0 }
 0x11e   :  { %v284_v60 = vadd.f32 %v490_v52, %v283_v56  ;;  %v306_v62 = vpop.f32.mrf.mxu1 }
 0x120   :  { %v307_v0 = vadd.f32 %v306_v62, %v284_v60 }
 0x12b   :  { %v326_v57 = vpop.f32.mrf.mxu2 }
 0x12c   :  { %v327_v58 = vadd.f32 %v326_v57, %v304_v55  ;;  %v349_v59 = vpop.f32.mrf.mxu3 }
 0x12e   :  { %v350_v61 = vadd.f32 %v349_v59, %v327_v58 }
 0x130   :  { %v355_v63 = vmax.f32 %v350_v61, 0.0 }
 0x132   :  { %393 = vmatmul.f32.vlgmr.msrb.gmra.mxu0 %v355_v63 }
 0x133   :  { %v329_v1 = vpop.f32.mrf.mxu2 }
 0x134   :  { %v330_v2 = vadd.f32 %v329_v1, %v307_v0  ;;  %v352_v3 = vpop.f32.mrf.mxu3 }
 0x136   :  { %v353_v4 = vadd.f32 %v352_v3, %v330_v2 }
 0x138   :  { %v356_v5 = vmax.f32 %v353_v4, 0.0 }
 0x13a   :  { %396 = vmatmul.f32.vlgmr.msrb.gmra.mxu1 %v356_v5 }
 0x1af   :  { %v394_v7 = vpop.f32.mrf.mxu0 }
 0x1b0   :  { %v395_v8 = vadd.f32 %v491_v6, %v394_v7 }
 0x1b2   :  { %v400_v9 = vsub.f32 0.0, %v395_v8 }
 0x1b4   :  { %v402_v10 = vmul.f32 1.442695, %v400_v9 }
 0x1b6   :  { %492 = vpow2.f32 %v402_v10 }
 0x1b7   :  { %v397_v11 = vpop.f32.mrf.mxu1 }
 0x1b8   :  { %v398_v12 = vadd.f32 %v491_v6, %v397_v11 }
 0x1ba   :  { %v401_v13 = vsub.f32 0.0, %v398_v12 }
 0x1bc   :  { %v493_v14 = vpop.eup %492  ;;  %v404_v15 = vmul.f32 1.442695, %v401_v13 }
 0x1bd   :  { %v406_v16 = vadd.f32 1.0, %v493_v14 }
 0x1be   :  { %494 = vpow2.f32 %v404_v15 }
 0x1bf   :  { %496 = vrcp.f32 %v406_v16  ;;  %v419_v22 = vand.u32 2147483648, %v406_v16  ;;  %v417_v24 = vand.u32 2147483647, %v406_v16  ;;  %vm413_vm2 = vweird.f32 %v406_v16 }
 0x1c1   :  { %v420_v27 = vor.u32 1.1754944e-38, %v419_v22  ;;  %vm418_vm4 = vcmp.eq.f32.partialorder %v417_v24, 8.507059e+37 }
 0x1c4   :  { %v495_v17 = vpop.eup %494 }
 0x1c5   :  { %v497_v18 = vpop.eup %496  ;;  %v407_v19 = vadd.f32 1.0, %v495_v17 }
 0x1c6   :  { %v409_v20 = vmul.f32 %v497_v18, %v406_v16  ;;  %vm414_vm1 = vweird.f32 %v497_v18 }
 0x1c7   :  { %498 = vrcp.f32 %v407_v19  ;;  %vm415_vm3 = vmor %vm413_vm2, %vm414_vm1  ;;  %v434_v32 = vand.u32 2147483648, %v407_v19  ;;  %v432_v34 = vand.u32 2147483647, %v407_v19  ;;  %vm428_vm6 = vweird.f32 %v407_v19 }
 0x1c8   :  { %v410_v21 = vsub.f32 1.0, %v409_v20 }
 0x1c9   :  { %v435_v36 = vor.u32 1.1754944e-38, %v434_v32  ;;  %vm433_vm8 = vcmp.eq.f32.partialorder %v432_v34, 8.507059e+37 }
 0x1ca   :  { %v411_v23 = vmul.f32 %v497_v18, %v410_v21 }
 0x1cc   :  { %v412_v25 = vadd.f32 %v497_v18, %v411_v23 }
 0x1cd   :  { %v499_v26 = vpop.eup %498 }
 0x1ce   :  { %v424_v28 = vmul.f32 %v499_v26, %v407_v19  ;;  %v416_v29 = vsel %vm415_vm3, %v497_v18, %v412_v25  ;;  %vm429_vm5 = vweird.f32 %v499_v26 }
 0x1cf   :  { %v421_v30 = vsel %vm418_vm4, %v420_v27, %v416_v29  ;;  %vm430_vm7 = vmor %vm428_vm6, %vm429_vm5 }
 0x1d0   :  { %v425_v31 = vsub.f32 1.0, %v424_v28  ;;  %438 = vst [vmem:[#allocation8] sm:$0xff] %v421_v30 }
 0x1d2   :  { %v426_v33 = vmul.f32 %v499_v26, %v425_v31 }
 0x1d4   :  { %v427_v35 = vadd.f32 %v499_v26, %v426_v33 }
 0x1d6   :  { %v431_v37 = vsel %vm430_vm7, %v499_v26, %v427_v35 }
 0x1d7   :  { %v436_v38 = vsel %vm433_vm8, %v435_v36, %v431_v37 }
 0x1d8   :  { %439 = vst [vmem:[#allocation8 + $0x8] sm:$0xff] %v436_v38 }
 0x1d9   :  { %452 = dma.vmem_to_hbm [thread:$0]  %s445_s22, 256, %s447_s25, [#allocation4], %s603_s9, %s603_s9, %s604_s10  }
 0x1da   :  { %600 = dma.done.wait [#allocation4], 256  }
 0x1db   :  { %601 = vsyncadd [#allocation4], 4294967040 }
 0x1dc   :  { %457 = vsyncpa [#allocation3], 1 }
 0x1dd   :  { %458 = vsyncpa [#allocation6], 1 }
 0x1de   :  { %459 = vsyncpa [#allocation4], 1 }

</bundles_post_ra>
